<compile_context>
chip_gen: v5e
topology: v5e:2x2
jax: 0.10.0
libtpu: 0.0.40
codegen_flags: <defaults>
</compile_context>

<pallas_src>
import functools

import jax
import jax.numpy as jnp
from jax.experimental import pallas as pl
from jax.experimental.pallas import tpu as pltpu

_LANE = 128
_SUBLANE = 8


# --------------------------------------------------------------------------- #
# Tiling helpers (VMEM-aware, cross-generation)
# --------------------------------------------------------------------------- #
def _vmem_budget_bytes():
    """Half of physical VMEM: generous on v5e/v6e (128 MiB), safe on v7x (64 MiB)."""
    try:
        cap = int(pltpu.get_tpu_info().vmem_capacity_bytes)
    except Exception:
        cap = 64 * 1024 * 1024  # conservative floor (v7x physical VMEM per core)
    return cap // 2


def _pick_tile(full, per_unit_bytes, unit, cap, budget_bytes):
    """Largest block extent along one axis s.t. double-buffered in+out fits VMEM.

    `per_unit_bytes` is the byte cost of one step along this axis (product of the
    other block dims times itemsize).  If the whole axis fits, split it in two
    (when possible) so the grid still has >= 2 parallel steps for megacore.
    """
    usable = (budget_bytes * 3) // 4                                # headroom
    max_by_vmem = max(unit, usable // max(1, 4 * per_unit_bytes))   # 4 = 2 bufs x (in+out)
    tile = min(full, cap, max_by_vmem)
    if tile >= full:
        if full >= 2 * unit:
            tile = -(-full // 2)  # ceil(full/2) -> grid has >= 2 steps
        else:
            return full           # tiny axis: single full-extent block
    # Blocks smaller than `full` must align to the hardware tiling unit.
    return max(unit, (tile // unit) * unit)


def _compiler_params(n_grid_dims, vmem_limit):
    return pltpu.CompilerParams(
        dimension_semantics=("parallel",) * n_grid_dims,
        vmem_limit_bytes=int(vmem_limit),
    )


# --------------------------------------------------------------------------- #
# Kernel bodies
# --------------------------------------------------------------------------- #
def _ln_lane_kernel(x_ref, w_ref, b_ref, o_ref, *, eps):
    """Normalize over the last (lane) axis of a (tile_rows, C) block."""
    x = x_ref[...].astype(jnp.float32)
    mean = jnp.mean(x, axis=-1, keepdims=True)
    xc = x - mean
    var = jnp.mean(xc * xc, axis=-1, keepdims=True)  # biased variance (== F.layer_norm)
    inv = jax.lax.rsqrt(var + eps)
    w = w_ref[...].astype(jnp.float32)
    b = b_ref[...].astype(jnp.float32)
    o_ref[...] = (xc * inv * w + b).astype(o_ref.dtype)


def _ln_packed_kernel(x_ref, savg_ref, st_ref, w_ref, b_ref, o_ref, *, eps):
    """Lane-packed small-C path: P groups of C channels packed along 128 lanes.

    savg (128, P) = 0/1 segment matrix / C ; st (P, 128) = 0/1 segment matrix.
    Segmented mean / mean-of-squared-deviation via MXU (f32, HIGHEST precision).
    """
    x = x_ref[...].astype(jnp.float32)      # (tile_rows, 128)
    savg = savg_ref[...]
    st = st_ref[...]
    hi = jax.lax.Precision.HIGHEST
    mean = jnp.dot(x, savg, precision=hi, preferred_element_type=jnp.float32)
    mean_b = jnp.dot(mean, st, precision=hi, preferred_element_type=jnp.float32)
    xc = x - mean_b
    var = jnp.dot(xc * xc, savg, precision=hi, preferred_element_type=jnp.float32)
    var_b = jnp.dot(var, st, precision=hi, preferred_element_type=jnp.float32)
    inv = jax.lax.rsqrt(var_b + eps)
    w = w_ref[...].astype(jnp.float32)      # (1, 128): weight replicated per group
    b = b_ref[...].astype(jnp.float32)
    o_ref[...] = (xc * inv * w + b).astype(o_ref.dtype)


def _ln_sublane_kernel(x_ref, w_ref, b_ref, o_ref, *, eps):
    """channels_first path: block (1, C, tile_hw), reduce over C (sublane axis)."""
    x = x_ref[...].astype(jnp.float32)       # (1, C, T)
    mean = jnp.mean(x, axis=1, keepdims=True)
    xc = x - mean
    var = jnp.mean(xc * xc, axis=1, keepdims=True)
    inv = jax.lax.rsqrt(var + eps)
    w = w_ref[...].astype(jnp.float32)       # (1, C, 1)
    b = b_ref[...].astype(jnp.float32)
    o_ref[...] = (xc * inv * w + b).astype(o_ref.dtype)


# --------------------------------------------------------------------------- #
# pallas_call wrappers
# --------------------------------------------------------------------------- #
def _layer_norm_lane(x2d, weight, bias, eps):
    rows, c = x2d.shape
    itemsize = x2d.dtype.itemsize
    budget = _vmem_budget_bytes()
    tile_rows = _pick_tile(rows, c * itemsize, _SUBLANE, 4096, budget)
    w2d = weight.astype(jnp.float32).reshape(1, c)
    b2d = bias.astype(jnp.float32).reshape(1, c)
    grid = (pl.cdiv(rows, tile_rows),)
    kernel = functools.partial(_ln_lane_kernel, eps=eps)
    return pl.pallas_call(
        kernel,
        out_shape=jax.ShapeDtypeStruct((rows, c), x2d.dtype),
        grid_spec=pltpu.PrefetchScalarGridSpec(
            num_scalar_prefetch=0,
            grid=grid,
            in_specs=[
                pl.BlockSpec((tile_rows, c), lambda i: (i, 0)),
                pl.BlockSpec((1, c), lambda i: (0, 0)),
                pl.BlockSpec((1, c), lambda i: (0, 0)),
            ],
            out_specs=pl.BlockSpec((tile_rows, c), lambda i: (i, 0)),
        ),
        compiler_params=_compiler_params(1, budget),
    )(x2d, w2d, b2d)


def _layer_norm_packed(x2d, weight, bias, eps):
    rows, c = x2d.shape
    p = _LANE // c
    xp = x2d.reshape(-1, _LANE)  # each 128-lane row holds p contiguous groups of c
    rp = xp.shape[0]
    itemsize = x2d.dtype.itemsize
    budget = _vmem_budget_bytes()
    tile_rows = _pick_tile(rp, _LANE * itemsize, _SUBLANE, 8192, budget)

    lane = jnp.arange(_LANE, dtype=jnp.int32)
    seg = (lane[:, None] // c) == jnp.arange(p, dtype=jnp.int32)[None, :]
    savg = seg.astype(jnp.float32) / float(c)            # (128, p)
    st = seg.T.astype(jnp.float32)                       # (p, 128)
    w_t = jnp.tile(weight.astype(jnp.float32), p).reshape(1, _LANE)
    b_t = jnp.tile(bias.astype(jnp.float32), p).reshape(1, _LANE)

    grid = (pl.cdiv(rp, tile_rows),)
    kernel = functools.partial(_ln_packed_kernel, eps=eps)
    yp = pl.pallas_call(
        kernel,
        out_shape=jax.ShapeDtypeStruct((rp, _LANE), x2d.dtype),
        grid_spec=pltpu.PrefetchScalarGridSpec(
            num_scalar_prefetch=0,
            grid=grid,
            in_specs=[
                pl.BlockSpec((tile_rows, _LANE), lambda i: (i, 0)),
                pl.BlockSpec((_LANE, p), lambda i: (0, 0)),
                pl.BlockSpec((p, _LANE), lambda i: (0, 0)),
                pl.BlockSpec((1, _LANE), lambda i: (0, 0)),
                pl.BlockSpec((1, _LANE), lambda i: (0, 0)),
            ],
            out_specs=pl.BlockSpec((tile_rows, _LANE), lambda i: (i, 0)),
        ),
        compiler_params=_compiler_params(1, budget),
    )(xp, savg, st, w_t, b_t)
    return yp.reshape(rows, c)


def _layer_norm_rows(x2d, weight, bias, eps):
    """channels_last dispatcher: lane-packed for small C dividing 128, else lane path."""
    rows, c = x2d.shape
    if c < _LANE and _LANE % c == 0 and (rows * c) % _LANE == 0:
        return _layer_norm_packed(x2d, weight, bias, eps)
    return _layer_norm_lane(x2d, weight, bias, eps)


def _layer_norm_channels_first(x, weight, bias, eps):
    """NCHW (or N,C,*) layernorm over axis=1 with no transposes."""
    n, c = x.shape[0], x.shape[1]
    x3 = x.reshape(n, c, -1)
    hw = x3.shape[2]
    itemsize = x3.dtype.itemsize
    budget = _vmem_budget_bytes()
    tile_hw = _pick_tile(hw, c * itemsize, _LANE, 8192, budget)
    w3 = weight.astype(jnp.float32).reshape(1, c, 1)
    b3 = bias.astype(jnp.float32).reshape(1, c, 1)
    grid = (n, pl.cdiv(hw, tile_hw))
    kernel = functools.partial(_ln_sublane_kernel, eps=eps)
    y3 = pl.pallas_call(
        kernel,
        out_shape=jax.ShapeDtypeStruct((n, c, hw), x3.dtype),
        grid_spec=pltpu.PrefetchScalarGridSpec(
            num_scalar_prefetch=0,
            grid=grid,
            in_specs=[
                pl.BlockSpec((1, c, tile_hw), lambda i, j: (i, 0, j)),
                pl.BlockSpec((1, c, 1), lambda i, j: (0, 0, 0)),
                pl.BlockSpec((1, c, 1), lambda i, j: (0, 0, 0)),
            ],
            out_specs=pl.BlockSpec((1, c, tile_hw), lambda i, j: (i, 0, j)),
        ),
        compiler_params=_compiler_params(2, budget),
    )(x3, w3, b3)
    return y3.reshape(x.shape)


# --------------------------------------------------------------------------- #
# Module
# --------------------------------------------------------------------------- #
class LayerNorm:
    """JAX/Pallas equivalent of the PyTorch LayerNorm (RepSLK) module."""

    def __init__(self, normalized_shape, eps=1e-6, data_format="channels_last"):
        if data_format not in ("channels_last", "channels_first"):
            raise NotImplementedError
        # Deterministic init, matching nn.Parameter(torch.ones/zeros).
        self.weight = jnp.ones((normalized_shape,), dtype=jnp.float32)
        self.bias = jnp.zeros((normalized_shape,), dtype=jnp.float32)
        self.eps = float(eps)
        self.data_format = data_format
        self.normalized_shape = (normalized_shape,)

    def __call__(self, x):
        if self.data_format == "channels_last":
            c = x.shape[-1]
            lead = x.shape[:-1]
            x2d = x.reshape(-1, c)
            y2d = _layer_norm_rows(x2d, self.weight, self.bias, self.eps)
            return y2d.reshape(*lead, c)
        else:  # channels_first: normalize over axis=1, layout preserved (no transposes)
            return _layer_norm_channels_first(x, self.weight, self.bias, self.eps)


# --------------------------------------------------------------------------- #
# References + self-test
# --------------------------------------------------------------------------- #
def _reference_channels_first(x, weight, bias, eps):
    u = jnp.mean(x, axis=1, keepdims=True)
    s = jnp.mean((x - u) ** 2, axis=1, keepdims=True)
    xn = (x - u) / jnp.sqrt(s + eps)
    return weight[None, :, None, None] * xn + bias[None, :, None, None]


def _reference_channels_last(x, weight, bias, eps):
    u = jnp.mean(x, axis=-1, keepdims=True)
    s = jnp.mean((x - u) ** 2, axis=-1, keepdims=True)
    xn = (x - u) / jnp.sqrt(s + eps)
    return xn * weight + bias


if __name__ == "__main__":
    key = jax.random.PRNGKey(0)
    k1, k2 = jax.random.split(key)

    N, C, H, W = 2, 4, 16, 16

    # channels_first (NCHW): transpose-free sublane-reduction kernel.
    x_cf = jax.random.normal(k1, (N, C, H, W), dtype=jnp.float32)
    ln_cf = LayerNorm(C, eps=1e-6, data_format="channels_first")
    y_cf = jax.block_until_ready(ln_cf(x_cf))
    ref_cf = _reference_channels_first(x_cf, ln_cf.weight, ln_cf.bias, ln_cf.eps)
    assert y_cf.shape == x_cf.shape
    err_cf = float(jnp.max(jnp.abs(y_cf - ref_cf)))
    assert jnp.allclose(y_cf, ref_cf, atol=1e-4, rtol=1e-4), err_cf

    # channels_last (NHWC), small C: lane-packed MXU-segmented kernel.
    x_cl = jax.random.normal(k2, (N, H, W, C), dtype=jnp.float32)
    ln_cl = LayerNorm(C, eps=1e-6, data_format="channels_last")
    y_cl = jax.block_until_ready(ln_cl(x_cl))
    ref_cl = _reference_channels_last(x_cl, ln_cl.weight, ln_cl.bias, ln_cl.eps)
    assert y_cl.shape == x_cl.shape
    err_cl = float(jnp.max(jnp.abs(y_cl - ref_cl)))
    assert jnp.allclose(y_cl, ref_cl, atol=1e-4, rtol=1e-4), err_cl

    # channels_last, large C: general lane-reduction kernel.
    C2 = 256
    x_big = jax.random.normal(key, (4, 8, C2), dtype=jnp.float32)
    ln_big = LayerNorm(C2, eps=1e-6, data_format="channels_last")
    y_big = jax.block_until_ready(ln_big(x_big))
    ref_big = _reference_channels_last(x_big, ln_big.weight, ln_big.bias, ln_big.eps)
    err_big = float(jnp.max(jnp.abs(y_big - ref_big)))
    assert jnp.allclose(y_big, ref_big, atol=1e-4, rtol=1e-4), err_big

    print("KERNEL_OK")
</pallas_src>

<mosaic_0001>
module attributes {stable_mosaic.version = 11 : i64} {
  func.func @_ln_sublane_kernel(%arg0: i32, %arg1: i32, %arg2: memref<1x4x128xf32, #tpu.memory_space<vmem>>, %arg3: memref<1x4x1xf32, #tpu.memory_space<vmem>>, %arg4: memref<1x4x1xf32, #tpu.memory_space<vmem>>, %arg5: memref<1x4x128xf32, #tpu.memory_space<vmem>>) attributes {dimension_semantics = [#tpu.dimension_semantics<parallel>, #tpu.dimension_semantics<parallel>], iteration_bounds = array<i64: 2, 2>, scalar_prefetch = 0 : i64, scratch_operands = 0 : i64, tpu.core_type = #tpu.core_type<tc>, window_params = [{transform_indices = @transform_0, window_bounds = array<i64: 1, 4, 128>}, {pipeline_mode = #tpu.pipeline_mode<synchronous>, transform_indices = @transform_1, window_bounds = array<i64: 1, 4, 1>}, {pipeline_mode = #tpu.pipeline_mode<synchronous>, transform_indices = @transform_2, window_bounds = array<i64: 1, 4, 1>}, {transform_indices = @transform_3, window_bounds = array<i64: 1, 4, 128>}]} {
    %c0 = arith.constant 0 : index
    %c0_0 = arith.constant 0 : index
    %c0_1 = arith.constant 0 : index
    %0 = vector.load %arg2[%c0, %c0_0, %c0_1] : memref<1x4x128xf32, #tpu.memory_space<vmem>>, vector<1x4x128xf32>
    %cst = arith.constant dense<0.000000e+00> : vector<1x128xf32>
    %1 = vector.multi_reduction <add>, %0, %cst [1] : vector<1x4x128xf32> to vector<1x128xf32>
    %2 = vector.shape_cast %1 : vector<1x128xf32> to vector<1x1x128xf32>
    %cst_2 = arith.constant 4.000000e+00 : f32
    %3 = vector.broadcast %cst_2 : f32 to vector<1x1x128xf32>
    %4 = arith.divf %2, %3 : vector<1x1x128xf32>
    %5 = vector.broadcast %4 : vector<1x1x128xf32> to vector<1x4x128xf32>
    %6 = arith.subf %0, %5 : vector<1x4x128xf32>
    %7 = arith.mulf %6, %6 : vector<1x4x128xf32>
    %cst_3 = arith.constant dense<0.000000e+00> : vector<1x128xf32>
    %8 = vector.multi_reduction <add>, %7, %cst_3 [1] : vector<1x4x128xf32> to vector<1x128xf32>
    %9 = vector.shape_cast %8 : vector<1x128xf32> to vector<1x1x128xf32>
    %cst_4 = arith.constant 4.000000e+00 : f32
    %10 = vector.broadcast %cst_4 : f32 to vector<1x1x128xf32>
    %11 = arith.divf %9, %10 : vector<1x1x128xf32>
    %cst_5 = arith.constant 9.99999997E-7 : f32
    %12 = vector.broadcast %cst_5 : f32 to vector<1x1x128xf32>
    %13 = arith.addf %11, %12 : vector<1x1x128xf32>
    %14 = math.rsqrt %13 : vector<1x1x128xf32>
    %c0_6 = arith.constant 0 : index
    %c0_7 = arith.constant 0 : index
    %c0_8 = arith.constant 0 : index
    %15 = vector.load %arg3[%c0_6, %c0_7, %c0_8] : memref<1x4x1xf32, #tpu.memory_space<vmem>>, vector<1x4x1xf32>
    %c0_9 = arith.constant 0 : index
    %c0_10 = arith.constant 0 : index
    %c0_11 = arith.constant 0 : index
    %16 = vector.load %arg4[%c0_9, %c0_10, %c0_11] : memref<1x4x1xf32, #tpu.memory_space<vmem>>, vector<1x4x1xf32>
    %17 = vector.broadcast %14 : vector<1x1x128xf32> to vector<1x4x128xf32>
    %18 = arith.mulf %6, %17 : vector<1x4x128xf32>
    %19 = vector.broadcast %15 : vector<1x4x1xf32> to vector<1x4x128xf32>
    %20 = arith.mulf %18, %19 : vector<1x4x128xf32>
    %21 = vector.broadcast %16 : vector<1x4x1xf32> to vector<1x4x128xf32>
    %22 = arith.addf %20, %21 : vector<1x4x128xf32>
    %c0_12 = arith.constant 0 : index
    %c0_13 = arith.constant 0 : index
    %c0_14 = arith.constant 0 : index
    %23 = vector.load %arg5[%c0_12, %c0_13, %c0_14] : memref<1x4x128xf32, #tpu.memory_space<vmem>>, vector<1x4x128xf32>
    tpu.vector_store %arg5[%c0_12, %c0_13, %c0_14], %22 {strides = array<i32>} : memref<1x4x128xf32, #tpu.memory_space<vmem>>, vector<1x4x128xf32>,
    return
  }
  func.func @transform_0(%arg0: i32, %arg1: i32) -> (i32, i32, i32) {
    %c0_i32 = arith.constant 0 : i32
    %c0_i32_0 = arith.constant 0 : i32
    return %arg0, %c0_i32, %arg1 : i32, i32, i32
  }
  func.func @transform_1(%arg0: i32, %arg1: i32) -> (i32, i32, i32) {
    %c0_i32 = arith.constant 0 : i32
    %c0_i32_0 = arith.constant 0 : i32
    %c0_i32_1 = arith.constant 0 : i32
    %c0_i32_2 = arith.constant 0 : i32
    return %c0_i32, %c0_i32_0, %c0_i32_1 : i32, i32, i32
  }
  func.func @transform_2(%arg0: i32, %arg1: i32) -> (i32, i32, i32) {
    %c0_i32 = arith.constant 0 : i32
    %c0_i32_0 = arith.constant 0 : i32
    %c0_i32_1 = arith.constant 0 : i32
    %c0_i32_2 = arith.constant 0 : i32
    return %c0_i32, %c0_i32_0, %c0_i32_1 : i32, i32, i32
  }
  func.func @transform_3(%arg0: i32, %arg1: i32) -> (i32, i32, i32) {
    %c0_i32 = arith.constant 0 : i32
    %c0_i32_0 = arith.constant 0 : i32
    return %arg0, %c0_i32, %arg1 : i32, i32, i32
  }
}

</mosaic_0001>

<bundles_post_ra>
// kernel: tpu_custom_call.1
= control target key start
LH: loop header
LB: loop body
LE: loop exit
PB: predicated region body
PF: predicated region fallthrough
CT: control target
= control target key end

     0   :  { %8 = vsyncpa [#allocation3], 0  ;;  %s769_s0 = inlined_call_operand.hbm [shape: f32[2,4,256], index: 0, kind: input, shape index: {}]   ;;  %s770_s1 = inlined_call_operand.vmem [shape: f32[1,4,1], index: 1, kind: input, shape index: {}]   ;;  %s771_s2 = inlined_call_operand.vmem [shape: f32[1,4,1], index: 2, kind: input, shape index: {}]   ;;  %s772_s3 = inlined_call_operand.hbm [shape: f32[2,4,256], index: 3, kind: output, shape index: {}]  }
   0x1   :  { %10 = vsyncpa [#allocation3 + $0x1], 0 }
   0x2   :  { %11 = vsyncpa [#allocation4], 0 }
   0x3   :  { %13 = vsyncpa [#allocation4 + $0x1], 0  ;;  %s615_s12 = smov 0   ;;  %s617_s13 = smov 0  }
   0x4   :  { %s619_s14 = smov 0   ;;  %s621_s15 = smov 0  }
   0x5   :  { %s623_s16 = smov 0   ;;  %s625_s17 = smov 0  }
   0x6   :  { %s627_s18 = smov 0   ;;  %s629_s19 = smov 0  }
   0x7 LB: > { %s363_s20 = sadd.s32 4294967295, %s591_s19   ;;  %s364_s21 = sadd.s32 4294967294, %s591_s19   ;;  %s591_s19 = sphi %s629_s19, %s19_s19   ;;  %s587_s18 = sphi %s627_s18, %s786_s18   ;;  %s583_s17 = sphi %s625_s17, %s785_s17   ;;  %s579_s16 = sphi %s623_s16, %s784_s16   ;;  %s575_s15 = sphi %s621_s15, %s783_s15   ;;  %s571_s14 = sphi %s619_s14, %s782_s14   ;;  %s567_s13 = sphi %s617_s13, %s781_s13   ;;  %s563_s12 = sphi %s615_s12, %s780_s12  }
   0x8   : > { %s28_s22 = sadd.s32 1, %s583_s17  ;;  %s31_s23 = sadd.s32 1, %s587_s18 }
   0x9   : > { %p29_p0 = scmp.ge.s32.totalorder %s28_s22, 2  ;;  %s40_s24 = sadd.s32 1, %s571_s14 }
   0xa   : > { %p47_p1 = scmp.ne.s32.totalorder %s571_s14, %s567_s13  ;;  %p48_p2 = scmp.eq.s32.totalorder %s591_s19, 0 }
   0xb   : > { %s788_s22 = smov (%p29_p0, %s28_s22), 0  ;;  %s790_s23 = smov (!%p29_p0, %s31_s23), %s587_s18 }
   0xc   : > { %s36_s25 = ssub.s32 %s583_s17, %s788_s22  ;;  %p668_p3 = por %p48_p2, %p47_p1 }
   0xd   : > { %p33_p4 = scmp.ge.s32.totalorder %s790_s23, 2  ;;  %p53_p5 = scmp.ne.s32.totalorder %s567_s13, %s563_s12 }
   0xe   : > { %p54_p6 = scmp.eq.s32.totalorder %s363_s20, 0  ;;  %p121_p7 = scmp.eq.s32.totalorder %s363_s20, 3 }
   0xf   : > { %s792_s23 = smov (%p33_p4, %s790_s23), 0  ;;  %p127_p10 = scmp.eq.s32.totalorder %s364_s21, 3 }
  0x10   : > { %775 = sst [smem:[#allocation8_spill]] %s792_s23  ;;  %p676_p8 = por %p54_p6, %p53_p5 }
  0x11   : > { %p680_p9 = por %p121_p7, %p47_p1  ;;  %s35_s29 = ssub.s32 %s587_s18, %s792_s23 }
  0x12   : > { %s37_s30 = sor.u32 %s36_s25, %s35_s29  ;;  %p686_p12 = por %p127_p10, %p53_p5 }
  0x13   : > { %p38_p11 = scmp.eq.s32.totalorder %s37_s30, 0  ;;  %p390_p13 = scmp.lt.s32.totalorder %s591_s19, 4 }
  0x14   : > { %s153_s5 = sand.u32 1, %s571_s14   ;;  %s368_s8 = sshll.u32 %s587_s18, 1 }
  0x15   : > { %s693_s6 = scalar_select %p38_p11, %s571_s14, %s40_s24  }
  0x16   : > { %s367_s7 = sshll.u32 %s153_s5, 2  ;;  %s161_s9 = sadd.s32 %s583_s17, %s368_s8 }
  0x17   : > { %s157_s10 = scalar_lea.vmem [#allocation2], %s367_s7  ;;  %s369_s20 = sshll.u32 %s161_s9, 2 }
  0x18   : > { %s167_s11 = sshll.u32 %s157_s10, 4  ;;  %s163_s29 = scalar_lea.hbm %s769_s0, %s369_s20  ;;  %s168_s11 = int_to_ptr.vmem [resolvable:$true] %s167_s11 }
  0x19   : > { %p383_p0 = pnand %p390_p13, %p668_p3  ;;  %s165_s30 = sshll.u32 %s163_s29, 4  ;;  %s166_s30 = int_to_ptr.hbm [resolvable:$true] %s165_s30 }
  0x1a   : > { %p370_p1 = scmp.ge.s32.totalorder %s591_s19, 1  ;;  %s154_s23 = scalar_lea.sflag [#allocation3], %s153_s5 }
  0x1b   : > { %385 = dma.hbm_to_vmem [thread:$0]  (!%p383_p0), %s166_s30, 64, %s168_s11, %s154_s23  }
  0x1c   : > { %p172_p2 = scmp.lt.s32.totalorder %s591_s19, 5 }
  0x1e   : > { %p173_p4 = pnand %p370_p1, %p172_p2 }
  0x1f   : > { %s705_s24 = sand.u32 (!%p173_p4), 1, %s567_s13  }
  0x20   : > { %176 = sbr.rel (%p173_p4) target bundleno = 168 (0xa8), region = 32  ;;  %s371_s7 = sshll.u32 (!%p173_p4), %s705_s24, 2 }
  0x21   : > { %s179_s8 = scalar_lea.sflag (!%p173_p4), [#allocation3], %s705_s24  ;;  %s182_s26 = scalar_lea.vmem (!%p173_p4), [#allocation2], %s371_s7 }
  0x25   : > { %554 = dma.done.wait (%p676_p8), %s179_s8, 64  }
  0x26   : > { %556 = vsyncadd (%p676_p8), %s179_s8, 4294967232  ;;  %v593_v0 = vmov 0   ;;  %v244_v1 = vld [vmem:[%s770_s1] sm:$0xf]  ;;  %v594_v3 = vmov 4.0   ;;  %vm207_vm0 = vcmask 1043456  }
  0x27   : > { %458 = vset.pattern.permute.xlu0 %v593_v0  ;;  %v245_v2 = vld [vmem:[%s771_s2] sm:$0xf]  ;;  %459 = vrcp.f32 %v594_v3  ;;  %s374_s27 = sshll.u32 %s579_s16, 1  ;;  %s205_s30 = scalar_lea.vmem [#allocation5], %s371_s7 }
  0x28   : > { %249 = vperm.xlu0 %458, %v244_v1   ;;  %v206_v7 = vld [vmem:[%s182_s26] sm:$0xf]  ;;  %s271_s11 = sadd.s32 %s575_s15, %s374_s27  ;;  %s275_s8 = sshll.u32 %s205_s30, 4  ;;  %s276_s8 = int_to_ptr.vmem [resolvable:$true] %s275_s8 }
  0x29   : > { %v208_v8 = vsel %vm207_vm0, %v206_v7, 0.0  ;;  %s375_s20 = sshll.u32 %s271_s11, 2  ;;  %s261_s15 = scalar_lea.sflag [#allocation4], %s705_s24 }
  0x2a   : > { %v209_v9 = vrot.slane %v208_v8, 4  ;;  %s273_s29 = scalar_lea.hbm %s772_s3, %s375_s20  ;;  %s513_s7 = scalar_lea.hbm %s772_s3, 16 }
  0x2b   : > { %s277_s26 = sshll.u32 %s273_s29, 4  ;;  %s278_s26 = int_to_ptr.hbm [resolvable:$true] %s277_s26 }
  0x2c   : > { %v210_v11 = vadd.f32 %v209_v9, %v208_v8  ;;  %s507_s16 = sshra.s32 %s278_s26, 4  ;;  %s508_s16 = int_to_ptr.hbm [resolvable:$true] %s507_s16 }
  0x2d   : > { %v460_v4 = vpop.eup %459  ;;  %s509_s23 = scalar_lea.hbm %s508_s16, 4  ;;  %p514_p7 = scmp.lt.s32.totalorder %s508_s16, %s772_s3 }
  0x2e   : > { %v216_v5 = vmul.f32 4.0, %v460_v4  ;;  %v211_v12 = vrot.slane %v210_v11, 2  ;;  %vm220_vm1 = vweird.f32 %v460_v4  ;;  %p510_p3 = scmp.ne.s32.totalorder %s508_s16, %s509_s23  ;;  %p515_p8 = scmp.lt.s32.totalorder %s513_s7, %s509_s23 }
  0x30   : > { %255 = vperm.xlu0 %458, %v245_v2   ;;  %v217_v6 = vsub.f32 1.0, %v216_v5  ;;  %v212_v14 = vadd.f32 %v211_v12, %v210_v11  ;;  %p511_p5 = pnand %p510_p3, %p680_p9  ;;  %p516_p10 = por %p515_p8, %p514_p7 }
  0x32   : > { %v218_v10 = vmul.f32 %v460_v4, %v217_v6  ;;  %v213_v15 = vrot.slane %v212_v14, 1  ;;  %p512_p6 = pneg %p511_p5 }
  0x34   : > { %v219_v13 = vadd.f32 %v460_v4, %v218_v10  ;;  %v214_v17 = vadd.f32 %v213_v15, %v212_v14  ;;  %p517_p11 = pnand %p516_p10, %p512_p6 }
  0x36   : > { %v221_v16 = vsel %vm220_vm1, %v460_v4, %v219_v13 }
  0x37   : > { %v222_v18 = vmul.f32 %v221_v16, %v214_v17 }
  0x39   : > { %v223_v19 = vsub.f32 %v206_v7, %v222_v18 }
  0x3b   : > { %v224_v20 = vmul.f32 %v223_v19, %v223_v19 }
  0x3d   : > { %v225_v21 = vsel %vm207_vm0, %v224_v20, 0.0 }
  0x3e   : > { %v226_v22 = vrot.slane %v225_v21, 4 }
  0x40   : > { %v227_v23 = vadd.f32 %v226_v22, %v225_v21 }
  0x42   : > { %v228_v24 = vrot.slane %v227_v23, 2 }
  0x44   : > { %v229_v25 = vadd.f32 %v228_v24, %v227_v23 }
  0x46   : > { %v230_v26 = vrot.slane %v229_v25, 1 }
  0x48   : > { %v231_v27 = vadd.f32 %v230_v26, %v229_v25 }
  0x4a   : > { %v232_v28 = vmul.f32 %v231_v27, %v221_v16 }
  0x4c   : > { %v233_v29 = vadd.f32 1e-06, %v232_v28 }
  0x4e   : > { %461 = vrsqrt.f32 %v233_v29  ;;  %vm240_vm2 = vweird.f32 %v233_v29 }
  0x54   : > { %v462_v30 = vpop.eup %461 }
  0x55   : > { %v235_v31 = vmul.f32 %v462_v30, %v233_v29  ;;  %vm241_vm3 = vweird.f32 %v462_v30 }
  0x56   : > { %vm242_vm4 = vmor %vm240_vm2, %vm241_vm3 }
  0x57   : > { %v236_v32 = vmul.f32 %v462_v30, %v235_v31 }
  0x59   : > { %v237_v33 = vmul.f32 0.5, %v236_v32 }
  0x5b   : > { %v238_v34 = vsub.f32 1.5, %v237_v33 }
  0x5d   : > { %v239_v35 = vmul.f32 %v462_v30, %v238_v34 }
  0x5f   : > { %v243_v37 = vsel %vm242_vm4, %v462_v30, %v239_v35 }
  0x60   : > { %v246_v38 = vmul.f32 %v243_v37, %v223_v19 }
  0x9a   : > { %v250_v36 = vpop.permute.xlu0 %249 }
  0x9b   : > { %v252_v39 = vmul.f32 %v250_v36, %v246_v38 }
  0xa2   : > { %v256_v40 = vpop.permute.xlu0 %255 }
  0xa3   : > { %v258_v41 = vadd.f32 %v256_v40, %v252_v39 }
  0xa5   : > { %259 = vst [vmem:[%s205_s30] sm:$0xf] %v258_v41 }
  0xa6   : > { %520 = shalt.err (!%p517_p11)
}
  0xa7   : > { %380 = dma.vmem_to_hbm [thread:$0]  (%p680_p9), %s276_s8, 64, %s278_s26, %s261_s15  }
  0xa8 PF: > { %p391_p13 = scmp.ge.s32.totalorder %s591_s19, 2  ;;  %s289_s24 = sand.u32 1, %s563_s12  }
  0xa9   : > { %s290_s11 = scalar_lea.sflag [#allocation4], %s289_s24 }
  0xaa   : > { %p387_p0 = pnand %p391_p13, %p686_p12 }
  0xac   : > { %p388_p1 = pneg %p387_p0 }
  0xae   : > { %558 = dma.done.wait (%p388_p1), %s290_s11, 64  }
  0xaf   : > { %560 = vsyncadd (%p388_p1), %s290_s11, 4294967232  ;;  %s19_s19 = sadd.s32 1, %s591_s19   ;;  %s779_s28 = sld [smem:[#allocation8_spill]] }
  0xb0   : > { %p16_p2 = scmp.ge.s32.totalorder %s19_s19, 6   ;;  %s780_s12 = smov %s567_s13 }
  0xb1   : > { %s781_s13 = smov %s571_s14  ;;  %s782_s14 = smov %s693_s6 }
  0xb2   : > { %s783_s15 = smov %s583_s17  ;;  %s784_s16 = smov %s587_s18 }
  0xb3   : > { %s785_s17 = smov %s788_s22  ;;  %18 = sbr.rel (!%p16_p2) target bundleno = 7 (0x7), region = 77 }
  0xb5   : > { %s786_s18 = smov %s779_s28 }
  0xb8   :  { %296 = vsyncpa [#allocation3], 1 }
  0xb9   :  { %298 = vsyncpa [#allocation3 + $0x1], 1 }
  0xba   :  { %299 = vsyncpa [#allocation4], 1 }
  0xbb   :  { %301 = vsyncpa [#allocation4 + $0x1], 1 }

</bundles_post_ra>
